<compile_context>
chip_gen: v6e
topology: v6e:2x2x1
jax: 0.10.0
libtpu: 0.0.40
codegen_flags: <defaults>
</compile_context>

<pallas_src>
import functools
import math

import jax
import jax.numpy as jnp
from jax.experimental import pallas as pl
from jax.experimental.pallas import tpu as pltpu

BATCH_NORM_EPSILON = 1e-05

_VMEM_LIMIT_BYTES = 32 * 1024 * 1024   # explicit scoped-VMEM limit (safe on all gens)
_VMEM_BUDGET_BYTES = 24 * 1024 * 1024  # working-set budget with headroom


def _round_up(x, m):
    return ((x + m - 1) // m) * m


def _choose_tiles(m, c_in, n_pad):
    """Pick (TM, TK) and padded extents so the double-buffered working set fits VMEM."""
    k_pad = _round_up(c_in, 128)
    tk = 128
    for cand in (512, 256, 128):           # 256-aligned K feeds the v6e/v7x MXU
        if k_pad % cand == 0:
            tk = cand
            break
    tm = 256 if m >= 256 else _round_up(m, 8)

    def working_set(tm_, tk_):
        # double-buffered x/w/y/stats tiles + single-buffered f32 accumulator
        dbl = tm_ * tk_ + tk_ * n_pad + tm_ * n_pad + 8 * n_pad
        return (2 * dbl + tm_ * n_pad) * 4

    while working_set(tm, tk) > _VMEM_BUDGET_BYTES and tk > 128:
        tk //= 2
    while working_set(tm, tk) > _VMEM_BUDGET_BYTES and tm > 8:
        tm = max(8, _round_up(tm // 2, 8))

    m_pad = _round_up(m, tm)
    return tm, tk, m_pad, k_pad


def _matmul_stats_kernel(x_ref, w_ref, y_ref, stats_ref, acc_ref):
    """Pass 1: y = x @ w (K-accumulated), plus per-M-tile sum / sumsq over rows."""
    k = pl.program_id(1)

    @pl.when(k == 0)
    def _init():
        acc_ref[...] = jnp.zeros_like(acc_ref)

    acc_ref[...] += jnp.dot(
        x_ref[...], w_ref[...], preferred_element_type=jnp.float32
    )

    @pl.when(k == pl.num_programs(1) - 1)
    def _finalize():
        y = acc_ref[...]
        y_ref[...] = y.astype(y_ref.dtype)
        sum_row = jnp.sum(y, axis=0, keepdims=True)          # (1, N)
        sq_row = jnp.sum(y * y, axis=0, keepdims=True)       # (1, N)
        pad_rows = jnp.zeros((6, y.shape[1]), dtype=jnp.float32)
        stats_ref[...] = jnp.concatenate([sum_row, sq_row, pad_rows], axis=0)


def _bn_apply_kernel(y_ref, scale_ref, bias_ref, o_ref, *, apply_relu):
    """Pass 2: lane-dense streaming normalize  out = [relu](y*scale + bias)."""
    out = y_ref[...] * scale_ref[...] + bias_ref[...]
    if apply_relu:
        out = jnp.maximum(out, 0.0)
    o_ref[...] = out.astype(o_ref.dtype)


def _matmul_bn_batchstats(x_mat, w_mat, gamma, beta, *, relu=False,
                          use_bf16_matmul=False):
    """(M, C_in) @ (C_in, C_out) followed by training-mode BatchNorm over M, opt ReLU."""
    m, c_in = x_mat.shape
    c_out = w_mat.shape[1]
    n_pad = _round_up(c_out, 128)
    tm, tk, m_pad, k_pad = _choose_tiles(m, c_in, n_pad)
    m_tiles = m_pad // tm
    k_tiles = k_pad // tk

    # Optional bf16 MXU inputs (accuracy knob); accumulation/BN math stay f32.
    in_dtype = jnp.bfloat16 if use_bf16_matmul else jnp.float32
    xp = jnp.pad(x_mat, ((0, m_pad - m), (0, k_pad - c_in))).astype(in_dtype)
    wp = jnp.pad(w_mat, ((0, k_pad - c_in), (0, n_pad - c_out))).astype(in_dtype)

    # ---- Pass 1: tiled matmul + partial BN statistics -----------------------
    y_full, stats = pl.pallas_call(
        _matmul_stats_kernel,
        out_shape=(
            jax.ShapeDtypeStruct((m_pad, n_pad), jnp.float32),
            jax.ShapeDtypeStruct((m_tiles * 8, n_pad), jnp.float32),
        ),
        grid=(m_tiles, k_tiles),
        in_specs=[
            pl.BlockSpec((tm, tk), lambda i, k: (i, k)),
            pl.BlockSpec((tk, n_pad), lambda i, k: (k, 0)),
        ],
        out_specs=(
            pl.BlockSpec((tm, n_pad), lambda i, k: (i, 0)),
            pl.BlockSpec((8, n_pad), lambda i, k: (i, 0)),
        ),
        scratch_shapes=[pltpu.VMEM((tm, n_pad), jnp.float32)],
        compiler_params=pltpu.CompilerParams(
            dimension_semantics=("parallel", "arbitrary"),
            vmem_limit_bytes=_VMEM_LIMIT_BYTES,
        ),
    )(xp, wp)

    # ---- Tiny host-side (XLA) reduction of per-tile stats -> scale/bias -----
    stats = stats.reshape(m_tiles, 8, n_pad)
    ch_sum = jnp.sum(stats[:, 0, :], axis=0)      # (n_pad,)
    ch_sumsq = jnp.sum(stats[:, 1, :], axis=0)    # (n_pad,)
    inv_m = 1.0 / float(m)                        # true (unpadded) M
    mean = ch_sum * inv_m
    var = jnp.maximum(ch_sumsq * inv_m - mean * mean, 0.0)   # biased var, clamp >= 0
    inv_std = jax.lax.rsqrt(var + BATCH_NORM_EPSILON)

    gamma_p = jnp.pad(gamma.astype(jnp.float32).reshape(-1), (0, n_pad - c_out))
    beta_p = jnp.pad(beta.astype(jnp.float32).reshape(-1), (0, n_pad - c_out))
    scale = (gamma_p * inv_std).reshape(1, n_pad)
    bias = (beta_p - mean * gamma_p * inv_std).reshape(1, n_pad)

    # ---- Pass 2: lane-dense normalization (+ optional fused ReLU) -----------
    out_full = pl.pallas_call(
        functools.partial(_bn_apply_kernel, apply_relu=relu),
        out_shape=jax.ShapeDtypeStruct((m_pad, n_pad), jnp.float32),
        grid=(m_tiles,),
        in_specs=[
            pl.BlockSpec((tm, n_pad), lambda i: (i, 0)),
            pl.BlockSpec((1, n_pad), lambda i: (0, 0)),
            pl.BlockSpec((1, n_pad), lambda i: (0, 0)),
        ],
        out_specs=pl.BlockSpec((tm, n_pad), lambda i: (i, 0)),
        compiler_params=pltpu.CompilerParams(
            dimension_semantics=("parallel",),
            vmem_limit_bytes=_VMEM_LIMIT_BYTES,
        ),
    )(y_full, scale, bias)

    return out_full[:m, :c_out]


# ---------------------------------------------------------------------------
# Projection shortcut (1x1 strided conv, bias=False) + BatchNorm2d (no ReLU)
# ---------------------------------------------------------------------------
def projection_forward_nhwc(x_nhwc, weight, gamma, beta, stride,
                            *, use_bf16_matmul=False):
    """NHWC fast path (no layout transposes). weight: (C_out, C_in) 1x1 conv."""
    n, h, w, c_in = x_nhwc.shape
    c_out = weight.shape[0]
    xs = x_nhwc[:, ::stride, ::stride, :]              # 1x1 conv stride == subsample
    ho, wo = xs.shape[1], xs.shape[2]
    x_mat = xs.reshape(n * ho * wo, c_in)
    w_mat = jnp.transpose(weight, (1, 0))              # (C_in, C_out)
    out_mat = _matmul_bn_batchstats(
        x_mat, w_mat, gamma, beta, relu=False, use_bf16_matmul=use_bf16_matmul
    )
    return out_mat.reshape(n, ho, wo, c_out)


def projection_forward(x_nchw, weight, gamma, beta, stride,
                       *, use_bf16_matmul=False):
    """PyTorch-layout (NCHW) adapter around the NHWC path."""
    # TODO(synk): the NCHW<->NHWC transposes below are XLA-side copies; callers
    #             holding NHWC activations should use projection_forward_nhwc.
    xs = x_nchw[:, :, ::stride, ::stride]
    x_nhwc = jnp.transpose(xs, (0, 2, 3, 1))
    out_nhwc = projection_forward_nhwc(
        x_nhwc, weight, gamma, beta, 1, use_bf16_matmul=use_bf16_matmul
    )
    return jnp.transpose(out_nhwc, (0, 3, 1, 2))


# ---------------------------------------------------------------------------
# ContrastiveHead: [Linear(bias=False) -> BatchNorm1d -> ReLU]* -> last layer
# (last layer: BN has gamma affine but no beta, and no ReLU)
# ---------------------------------------------------------------------------
def contrastive_head_forward(x, weights, gammas, betas, *, use_bf16_matmul=False):
    """x: (B, C_in). weights[i]: (dim_i, C_prev) torch Linear layout."""
    num_layers = len(weights)
    h = x
    for i in range(num_layers):
        relu = i != num_layers - 1
        w_mat = jnp.transpose(weights[i], (1, 0))      # (C_prev, dim_i)
        h = _matmul_bn_batchstats(
            h, w_mat, gammas[i], betas[i], relu=relu,
            use_bf16_matmul=use_bf16_matmul,
        )
    return h


# ---------------------------------------------------------------------------
# Parameter init mirroring the PyTorch module defaults
# ---------------------------------------------------------------------------
def init_projection_params(key, in_channels, out_channels):
    """variance_scaling trunc-normal init for the 1x1 conv weight; BN gamma=1, beta=0."""
    fan_in = in_channels * 1 * 1
    stddev = math.sqrt(1.0 / max(1.0, fan_in)) / 0.8796256610342398
    w = (
        jax.random.truncated_normal(
            key, -2.0, 2.0, (out_channels, in_channels), dtype=jnp.float32
        )
        * stddev
    )
    gamma = jnp.ones((out_channels,), dtype=jnp.float32)
    beta = jnp.zeros((out_channels,), dtype=jnp.float32)
    return w, gamma, beta


def init_head_params(key, channels_in, out_dim, num_layers):
    """Linear weights ~ N(0, 0.01); BN gamma=1; beta=0 (last layer has no beta)."""
    keys = jax.random.split(key, num_layers)
    weights, gammas, betas = [], [], []
    prev = channels_in
    for i in range(num_layers):
        dim = channels_in if i != num_layers - 1 else out_dim
        w = 0.01 * jax.random.normal(keys[i], (dim, prev), dtype=jnp.float32)
        weights.append(w)
        gammas.append(jnp.ones((dim,), dtype=jnp.float32))
        betas.append(jnp.zeros((dim,), dtype=jnp.float32))  # last-layer beta=None -> 0
        prev = dim
    return weights, gammas, betas


if __name__ == "__main__":
    key = jax.random.PRNGKey(0)
    k_x, k_w, k_hx, k_hw = jax.random.split(key, 4)

    # ----------------- Test 1: Projection shortcut (conv1x1 + BN2d) ----------
    n, c_in, h, w = 2, 4, 16, 16
    c_out, stride = 8, 2

    x = jax.random.normal(k_x, (n, c_in, h, w), dtype=jnp.float32)
    weight, gamma, beta = init_projection_params(k_w, c_in, c_out)

    out = projection_forward(x, weight, gamma, beta, stride)
    out = jax.block_until_ready(out)
    assert out.shape == (n, c_out, h // stride, w // stride), out.shape

    # Pure-JAX reference (PyTorch training-mode BN after 1x1 strided conv).
    xs = x[:, :, ::stride, ::stride]
    xm = jnp.transpose(xs, (0, 2, 3, 1)).reshape(-1, c_in)
    y = xm @ weight.T
    mean = jnp.mean(y, axis=0)
    var = jnp.mean((y - mean) ** 2, axis=0)
    ref = (y - mean) * jax.lax.rsqrt(var + BATCH_NORM_EPSILON) * gamma + beta
    ref = jnp.transpose(
        ref.reshape(n, h // stride, w // stride, c_out), (0, 3, 1, 2)
    )
    err = float(jnp.max(jnp.abs(out - ref)))
    assert err < 1e-2, f"projection max abs err vs reference: {err}"

    # ----------------- Test 2: ContrastiveHead (Linear + BN1d + ReLU) --------
    batch, channels_in, out_dim, num_layers = 8, 32, 16, 2
    hx = jax.random.normal(k_hx, (batch, channels_in), dtype=jnp.float32)
    weights, gammas, betas = init_head_params(k_hw, channels_in, out_dim, num_layers)

    hout = contrastive_head_forward(hx, weights, gammas, betas)
    hout = jax.block_until_ready(hout)
    assert hout.shape == (batch, out_dim), hout.shape

    # Pure-JAX reference of the head.
    href = hx
    for i in range(num_layers):
        yh = href @ weights[i].T
        mh = jnp.mean(yh, axis=0)
        vh = jnp.mean((yh - mh) ** 2, axis=0)
        href = (yh - mh) * jax.lax.rsqrt(vh + BATCH_NORM_EPSILON) * gammas[i] + betas[i]
        if i != num_layers - 1:
            href = jnp.maximum(href, 0.0)
    herr = float(jnp.max(jnp.abs(hout - href)))
    assert herr < 1e-2, f"head max abs err vs reference: {herr}"

    print("KERNEL_OK")
</pallas_src>

<mosaic_0001>
module attributes {stable_mosaic.version = 11 : i64} {
  func.func @_matmul_stats_kernel(%arg0: i32, %arg1: i32, %arg2: memref<128x128xf32, #tpu.memory_space<vmem>>, %arg3: memref<128x128xf32, #tpu.memory_space<vmem>>, %arg4: memref<128x128xf32, #tpu.memory_space<vmem>>, %arg5: memref<8x128xf32, #tpu.memory_space<vmem>>, %arg6: memref<128x128xf32, #tpu.memory_space<vmem>>) attributes {dimension_semantics = [#tpu.dimension_semantics<parallel>, #tpu.dimension_semantics<arbitrary>], iteration_bounds = array<i64: 1, 1>, scalar_prefetch = 0 : i64, scratch_operands = 1 : i64, tpu.core_type = #tpu.core_type<tc>, window_params = [{transform_indices = @transform_0, window_bounds = array<i64: 128, 128>}, {transform_indices = @transform_1, window_bounds = array<i64: 128, 128>}, {transform_indices = @transform_2, window_bounds = array<i64: 128, 128>}, {transform_indices = @transform_3, window_bounds = array<i64: 8, 128>}]} {
    %c0_i32 = arith.constant 0 : i32
    %0 = arith.cmpi eq, %arg1, %c0_i32 : i32
    %1 = arith.extui %0 : i1 to i32
    %c0_i32_0 = arith.constant 0 : i32
    %2 = arith.cmpi ne, %1, %c0_i32_0 : i32
    scf.if %2 {
      %cst_10 = arith.constant 0.000000e+00 : f32
      %12 = vector.broadcast %cst_10 : f32 to vector<128x128xf32>
      %c0_11 = arith.constant 0 : index
      %c0_12 = arith.constant 0 : index
      %13 = vector.load %arg6[%c0_11, %c0_12] : memref<128x128xf32, #tpu.memory_space<vmem>>, vector<128x128xf32>
      tpu.vector_store %arg6[%c0_11, %c0_12], %12 {strides = array<i32>} : memref<128x128xf32, #tpu.memory_space<vmem>>, vector<128x128xf32>,
    } else {
    }
    %c0 = arith.constant 0 : index
    %c0_1 = arith.constant 0 : index
    %3 = vector.load %arg6[%c0, %c0_1] : memref<128x128xf32, #tpu.memory_space<vmem>>, vector<128x128xf32>
    %c0_2 = arith.constant 0 : index
    %c0_3 = arith.constant 0 : index
    %4 = vector.load %arg2[%c0_2, %c0_3] : memref<128x128xf32, #tpu.memory_space<vmem>>, vector<128x128xf32>
    %c0_4 = arith.constant 0 : index
    %c0_5 = arith.constant 0 : index
    %5 = vector.load %arg3[%c0_4, %c0_5] : memref<128x128xf32, #tpu.memory_space<vmem>>, vector<128x128xf32>
    %cst = arith.constant dense<0.000000e+00> : vector<128x128xf32>
    %6 = tpu.matmul %4, %5, %cst {dimension_numbers = #tpu.dot_dimension_numbers<[1], [0], [0], [1], [0, 0, 1, 1], [], []>} : vector<128x128xf32>, vector<128x128xf32>, vector<128x128xf32> -> vector<128x128xf32>
    %7 = arith.addf %3, %6 : vector<128x128xf32>
    %c0_6 = arith.constant 0 : index
    %c0_7 = arith.constant 0 : index
    %8 = vector.load %arg6[%c0_6, %c0_7] : memref<128x128xf32, #tpu.memory_space<vmem>>, vector<128x128xf32>
    tpu.vector_store %arg6[%c0_6, %c0_7], %7 {strides = array<i32>} : memref<128x128xf32, #tpu.memory_space<vmem>>, vector<128x128xf32>,
    %c0_i32_8 = arith.constant 0 : i32
    %9 = arith.cmpi eq, %arg1, %c0_i32_8 : i32
    %10 = arith.extui %9 : i1 to i32
    %c0_i32_9 = arith.constant 0 : i32
    %11 = arith.cmpi ne, %10, %c0_i32_9 : i32
    scf.if %11 {
      %c0_10 = arith.constant 0 : index
      %c0_11 = arith.constant 0 : index
      %12 = vector.load %arg6[%c0_10, %c0_11] : memref<128x128xf32, #tpu.memory_space<vmem>>, vector<128x128xf32>
      %c0_12 = arith.constant 0 : index
      %c0_13 = arith.constant 0 : index
      %13 = vector.load %arg4[%c0_12, %c0_13] : memref<128x128xf32, #tpu.memory_space<vmem>>, vector<128x128xf32>
      tpu.vector_store %arg4[%c0_12, %c0_13], %12 {strides = array<i32>} : memref<128x128xf32, #tpu.memory_space<vmem>>, vector<128x128xf32>,
      %cst_14 = arith.constant dense<0.000000e+00> : vector<128xf32>
      %14 = vector.multi_reduction <add>, %12, %cst_14 [0] : vector<128x128xf32> to vector<128xf32>
      %15 = vector.shape_cast %14 : vector<128xf32> to vector<1x128xf32>
      %16 = arith.mulf %12, %12 : vector<128x128xf32>
      %cst_15 = arith.constant dense<0.000000e+00> : vector<128xf32>
      %17 = vector.multi_reduction <add>, %16, %cst_15 [0] : vector<128x128xf32> to vector<128xf32>
      %18 = vector.shape_cast %17 : vector<128xf32> to vector<1x128xf32>
      %cst_16 = arith.constant 0.000000e+00 : f32
      %19 = vector.broadcast %cst_16 : f32 to vector<6x128xf32>
      %20 = tpu.concatenate %15, %18, %19 in 0 : vector<1x128xf32>, vector<1x128xf32>, vector<6x128xf32> -> vector<8x128xf32>
      %c0_17 = arith.constant 0 : index
      %c0_18 = arith.constant 0 : index
      %21 = vector.load %arg5[%c0_17, %c0_18] : memref<8x128xf32, #tpu.memory_space<vmem>>, vector<8x128xf32>
      tpu.vector_store %arg5[%c0_17, %c0_18], %20 {strides = array<i32>} : memref<8x128xf32, #tpu.memory_space<vmem>>, vector<8x128xf32>,
    } else {
    }
    return
  }
  func.func @transform_0(%arg0: i32, %arg1: i32) -> (i32, i32) {
    %c0_i32 = arith.constant 0 : i32
    return %arg0, %arg1 : i32, i32
  }
  func.func @transform_1(%arg0: i32, %arg1: i32) -> (i32, i32) {
    %c0_i32 = arith.constant 0 : i32
    %c0_i32_0 = arith.constant 0 : i32
    return %arg1, %c0_i32 : i32, i32
  }
  func.func @transform_2(%arg0: i32, %arg1: i32) -> (i32, i32) {
    %c0_i32 = arith.constant 0 : i32
    %c0_i32_0 = arith.constant 0 : i32
    return %arg0, %c0_i32 : i32, i32
  }
  func.func @transform_3(%arg0: i32, %arg1: i32) -> (i32, i32) {
    %c0_i32 = arith.constant 0 : i32
    %c0_i32_0 = arith.constant 0 : i32
    return %arg0, %c0_i32 : i32, i32
  }
}

</mosaic_0001>

<bundles_post_ra>
// kernel: tpu_custom_call.1
= control target key start
LH: loop header
LB: loop body
LE: loop exit
PB: predicated region body
PF: predicated region fallthrough
CT: control target
= control target key end

     0   :  { %9 = vsyncpa [#allocation4], 0  ;;  %s685_s0 = inlined_call_operand.hbm [shape: f32[128,128], index: 0, kind: input, shape index: {}]   ;;  %s686_s1 = inlined_call_operand.hbm [shape: f32[128,128], index: 1, kind: input, shape index: {}]   ;;  %s687_s2 = inlined_call_operand.hbm [shape: f32[128,128], index: 2, kind: output, shape index: {0}]   ;;  %s688_s3 = inlined_call_operand.hbm [shape: f32[8,128], index: 3, kind: output, shape index: {1}]  }
   0x1   :  { %10 = vsyncpa [#allocation7], 0 }
   0x2   :  { %11 = vsyncpa [#allocation5], 0 }
   0x3   :  { %12 = vsyncpa [#allocation10], 0  ;;  %s632_s12 = smov [#allocation3]  }
   0x4   :  { %s18_s13 = sshll.u32 %s632_s12, 4  ;;  %s19_s13 = int_to_ptr.vmem [resolvable:$true] %s18_s13 }
   0x5   :  { %s552_s14 = scalar_lea.vmem %s19_s13, 2048  ;;  %p557_p1 = scmp.lt.s32.totalorder %s19_s13, %s19_s13 }
   0x6   :  { %p553_p0 = scmp.ne.s32.totalorder %s19_s13, %s552_s14  ;;  %p558_p2 = scmp.lt.s32.totalorder %s552_s14, %s552_s14 }
   0x8   :  { %p559_p3 = por %p558_p2, %p557_p1 }
   0xa   :  { %p560_p4 = pnand %p559_p3, %p553_p0 }
   0xc   :  { %563 = shalt.err (!%p560_p4)
}
   0xd   :  { %s633_s15 = smov 128   ;;  %s634_s16 = smov 8  }
   0xe   :  { %24 = dma.hbm_to_vmem [thread:$0]  %s685_s0, 2048, %s19_s13, [#allocation4], %s633_s15, %s633_s15, %s634_s16  }
   0xf   :  { %s635_s19 = smov [#allocation6]  }
  0x10   :  { %s30_s20 = sshll.u32 %s635_s19, 4  ;;  %s31_s20 = int_to_ptr.vmem [resolvable:$true] %s30_s20 }
  0x11   :  { %s572_s21 = scalar_lea.vmem %s31_s20, 2048  ;;  %p577_p6 = scmp.lt.s32.totalorder %s31_s20, %s31_s20 }
  0x12   :  { %p573_p5 = scmp.ne.s32.totalorder %s31_s20, %s572_s21  ;;  %p578_p7 = scmp.lt.s32.totalorder %s572_s21, %s572_s21 }
  0x14   :  { %p579_p8 = por %p578_p7, %p577_p6 }
  0x16   :  { %p580_p9 = pnand %p579_p8, %p573_p5 }
  0x18   :  { %583 = shalt.err (!%p580_p9)
}
  0x19   :  { %36 = dma.hbm_to_vmem [thread:$0]  %s686_s1, 2048, %s31_s20, [#allocation7], %s633_s15, %s633_s15, %s634_s16  }
  0x1a   :  { %624 = dma.done.wait [#allocation4], 2048  }
  0x1b   :  { %625 = vsyncadd [#allocation4], 4294965248 }
  0x1c   :  { %626 = dma.done.wait [#allocation7], 2048  }
  0x1d   :  { %627 = vsyncadd [#allocation7], 4294965248  ;;  %v110_v0 = vld [vmem:[#allocation6 + $0x78] sm:$0xff]  ;;  %v109_v1 = vld [vmem:[#allocation6 + $0x70] sm:$0xff]  ;;  %s636_s0 = smov [#allocation8]  }
  0x1e   :  { %450 = vmatprep.subr.mxu0 %v110_v0  ;;  %506 = vmatprep.subr.mxu1 %v110_v0  ;;  %v108_v2 = vld [vmem:[#allocation6 + $0x68] sm:$0xff]  ;;  %v107_v3 = vld [vmem:[#allocation6 + $0x60] sm:$0xff]  ;;  %v106_v4 = vld [vmem:[#allocation6 + $0x58] sm:$0xff]  ;;  %s391_s1 = sshll.u32 %s636_s0, 4  ;;  %s392_s1 = int_to_ptr.vmem [resolvable:$true] %s391_s1 }
  0x1f   :  { %451 = vmatpush3.msra.mxu0 %v110_v0  ;;  %522 = vmatpush3.msra.mxu1 %v110_v0  ;;  %v105_v5 = vld [vmem:[#allocation6 + $0x50] sm:$0xff]  ;;  %v104_v6 = vld [vmem:[#allocation6 + $0x48] sm:$0xff]  ;;  %v103_v7 = vld [vmem:[#allocation6 + $0x40] sm:$0xff]  ;;  %s584_s24 = scalar_lea.vmem %s392_s1, 2048  ;;  %p589_p11 = scmp.lt.s32.totalorder %s392_s1, %s392_s1 }
  0x20   :  { %452 = vmatprep.subr.mxu0 %v109_v1  ;;  %507 = vmatprep.subr.mxu1 %v109_v1  ;;  %v102_v8 = vld [vmem:[#allocation6 + $0x38] sm:$0xff]  ;;  %v101_v9 = vld [vmem:[#allocation6 + $0x30] sm:$0xff]  ;;  %v79_v10 = vld [vmem:[#allocation3] sm:$0xff]  ;;  %p585_p10 = scmp.ne.s32.totalorder %s392_s1, %s584_s24  ;;  %p590_p12 = scmp.lt.s32.totalorder %s584_s24, %s584_s24 }
  0x21   :  { %453 = vmatpush3.msra.mxu0 %v109_v1  ;;  %523 = vmatpush3.msra.mxu1 %v109_v1  ;;  %v100_v11 = vld [vmem:[#allocation6 + $0x28] sm:$0xff]  ;;  %v99_v12 = vld [vmem:[#allocation6 + $0x20] sm:$0xff]  ;;  %v98_v13 = vld [vmem:[#allocation6 + $0x18] sm:$0xff] }
  0x22   :  { %454 = vmatprep.subr.mxu0 %v108_v2  ;;  %508 = vmatprep.subr.mxu1 %v108_v2  ;;  %v97_v14 = vld [vmem:[#allocation6 + $0x10] sm:$0xff]  ;;  %v96_v15 = vld [vmem:[#allocation6 + $0x8] sm:$0xff]  ;;  %v95_v16 = vld [vmem:[#allocation6] sm:$0xff]  ;;  %p591_p13 = por %p590_p12, %p589_p11 }
  0x23   :  { %455 = vmatpush3.msra.mxu0 %v108_v2  ;;  %524 = vmatpush3.msra.mxu1 %v108_v2  ;;  %v80_v17 = vld [vmem:[#allocation3 + $0x8] sm:$0xff]  ;;  %v81_v18 = vld [vmem:[#allocation3 + $0x10] sm:$0xff]  ;;  %v87_v19 = vld [vmem:[#allocation3 + $0x40] sm:$0xff] }
  0x24   :  { %456 = vmatprep.subr.mxu0 %v107_v3  ;;  %509 = vmatprep.subr.mxu1 %v107_v3  ;;  %v88_v20 = vld [vmem:[#allocation3 + $0x48] sm:$0xff]  ;;  %v89_v21 = vld [vmem:[#allocation3 + $0x50] sm:$0xff]  ;;  %v82_v22 = vld [vmem:[#allocation3 + $0x18] sm:$0xff]  ;;  %p592_p0 = pnand %p591_p13, %p585_p10 }
  0x25   :  { %457 = vmatpush3.msra.mxu0 %v107_v3  ;;  %525 = vmatpush3.msra.mxu1 %v107_v3  ;;  %v83_v23 = vld [vmem:[#allocation3 + $0x20] sm:$0xff]  ;;  %v90_v24 = vld [vmem:[#allocation3 + $0x58] sm:$0xff]  ;;  %v84_v26 = vld [vmem:[#allocation3 + $0x28] sm:$0xff] }
  0x26   :  { %458 = vmatprep.subr.mxu0 %v106_v4  ;;  %510 = vmatprep.subr.mxu1 %v106_v4  ;;  %v91_v25 = vld [vmem:[#allocation3 + $0x60] sm:$0xff]  ;;  %v85_v27 = vld [vmem:[#allocation3 + $0x30] sm:$0xff]  ;;  %v92_v28 = vld [vmem:[#allocation3 + $0x68] sm:$0xff] }
  0x27   :  { %459 = vmatpush3.msra.mxu0 %v106_v4  ;;  %526 = vmatpush3.msra.mxu1 %v106_v4  ;;  %v93_v29 = vld [vmem:[#allocation3 + $0x70] sm:$0xff]  ;;  %v86_v30 = vld [vmem:[#allocation3 + $0x38] sm:$0xff] }
  0x28   :  { %460 = vmatprep.subr.mxu0 %v105_v5  ;;  %511 = vmatprep.subr.mxu1 %v105_v5  ;;  %v94_v31 = vld [vmem:[#allocation3 + $0x78] sm:$0xff] }
  0x29   :  { %461 = vmatpush3.msra.mxu0 %v105_v5  ;;  %527 = vmatpush3.msra.mxu1 %v105_v5 }
  0x2a   :  { %462 = vmatprep.subr.mxu0 %v104_v6  ;;  %512 = vmatprep.subr.mxu1 %v104_v6 }
  0x2b   :  { %463 = vmatpush3.msra.mxu0 %v104_v6  ;;  %528 = vmatpush3.msra.mxu1 %v104_v6 }
  0x2c   :  { %464 = vmatprep.subr.mxu0 %v103_v7  ;;  %513 = vmatprep.subr.mxu1 %v103_v7 }
  0x2d   :  { %465 = vmatpush3.msra.mxu0 %v103_v7  ;;  %529 = vmatpush3.msra.mxu1 %v103_v7 }
  0x2e   :  { %466 = vmatprep.subr.mxu0 %v102_v8  ;;  %514 = vmatprep.subr.mxu1 %v102_v8 }
  0x2f   :  { %467 = vmatpush3.msra.mxu0 %v102_v8  ;;  %530 = vmatpush3.msra.mxu1 %v102_v8 }
  0x30   :  { %468 = vmatprep.subr.mxu0 %v101_v9  ;;  %482 = vmatprep.mubr.f32.mxu0 %v79_v10 }
  0x31   :  { %469 = vmatpush3.msra.mxu0 %v101_v9  ;;  %515 = vmatprep.subr.mxu1 %v101_v9 }
  0x32   :  { %470 = vmatprep.subr.mxu0 %v100_v11  ;;  %531 = vmatpush3.msra.mxu1 %v101_v9 }
  0x33   :  { %471 = vmatpush3.msra.mxu0 %v100_v11  ;;  %516 = vmatprep.subr.mxu1 %v100_v11 }
  0x34   :  { %472 = vmatprep.subr.mxu0 %v99_v12  ;;  %532 = vmatpush3.msra.mxu1 %v100_v11 }
  0x35   :  { %473 = vmatpush3.msra.mxu0 %v99_v12  ;;  %517 = vmatprep.subr.mxu1 %v99_v12 }
  0x36   :  { %474 = vmatprep.subr.mxu0 %v98_v13  ;;  %533 = vmatpush3.msra.mxu1 %v99_v12 }
  0x37   :  { %475 = vmatpush3.msra.mxu0 %v98_v13  ;;  %518 = vmatprep.subr.mxu1 %v98_v13 }
  0x38   :  { %476 = vmatprep.subr.mxu0 %v97_v14  ;;  %534 = vmatpush3.msra.mxu1 %v98_v13 }
  0x39   :  { %477 = vmatpush3.msra.mxu0 %v97_v14  ;;  %519 = vmatprep.subr.mxu1 %v97_v14 }
  0x3a   :  { %478 = vmatprep.subr.mxu0 %v96_v15  ;;  %535 = vmatpush3.msra.mxu1 %v97_v14 }
  0x3b   :  { %479 = vmatpush3.msra.mxu0 %v96_v15  ;;  %520 = vmatprep.subr.mxu1 %v96_v15 }
  0x3c   :  { %480 = vmatprep.subr.mxu0 %v95_v16  ;;  %536 = vmatpush3.msra.mxu1 %v96_v15 }
  0x3d   :  { %481 = vmatpush3.msra.mxu0 %v95_v16  ;;  %521 = vmatprep.subr.mxu1 %v95_v16 }
  0x3e   :  { %483 = vmatmul.mubr.f32.vlgmr.msra.gmra.mxu0 %v80_v17  ;;  %537 = vmatpush3.msra.mxu1 %v95_v16 }
  0x3f   :  { %485 = vmatprep.mubr.f32.mxu0 %v81_v18  ;;  %494 = vmatprep.mubr.f32.mxu1 %v87_v19 }
  0x40   :  { %495 = vmatmul.mubr.f32.vlgmr.msra.gmra.mxu1 %v88_v20 }
  0x41   :  { %497 = vmatprep.mubr.f32.mxu1 %v89_v21 }
  0x42   :  { %486 = vmatmul.mubr.f32.gmra.mxu0 %v82_v22 }
  0x43   :  { %488 = vmatprep.mubr.f32.mxu0 %v83_v23 }
  0x44   :  { %498 = vmatmul.mubr.f32.gmra.mxu1 %v90_v24 }
  0x45   :  { %500 = vmatprep.mubr.f32.mxu1 %v91_v25 }
  0x46   :  { %489 = vmatmul.mubr.f32.gmra.mxu0 %v84_v26 }
  0x47   :  { %491 = vmatprep.mubr.f32.mxu0 %v85_v27 }
  0x48   :  { %501 = vmatmul.mubr.f32.gmra.mxu1 %v92_v28 }
  0x49   :  { %503 = vmatprep.mubr.f32.mxu1 %v93_v29 }
  0x4a   :  { %492 = vmatmul.mubr.f32.gmra.mxu0 %v86_v30 }
  0x4c   :  { %504 = vmatmul.mubr.f32.gmra.mxu1 %v94_v31 }
  0xfe   :  { %v484_v32 = vpop.f32.mrf.mxu0 }
  0xff   :  { %308 = vst [vmem:[#allocation8 + $0x8] sm:$0xff] %v484_v32  ;;  %v345_v38 = vmul.f32 %v484_v32, %v484_v32 }
 0x100   :  { %v177_v33 = vpop.f32.mrf.mxu0  ;;  %v670_v34 = vpop.f32.mrf.mxu1 }
 0x101   :  { %307 = vst [vmem:[#allocation8] sm:$0xff] %v177_v33  ;;  %v344_v35 = vmul.f32 %v177_v33, %v177_v33  ;;  %316 = vst [vmem:[#allocation8 + $0x48] sm:$0xff] %v670_v34  ;;  %v323_v39 = vadd.f32 %v484_v32, %v177_v33 }
 0x102   :  { %v487_v36 = vpop.f32.mrf.mxu0  ;;  %v217_v37 = vpop.f32.mrf.mxu1 }
 0x103   :  { %310 = vst [vmem:[#allocation8 + $0x18] sm:$0xff] %v487_v36  ;;  %315 = vst [vmem:[#allocation8 + $0x40] sm:$0xff] %v217_v37  ;;  %v360_v42 = vadd.f32 %v345_v38, %v344_v35  ;;  %v347_v47 = vmul.f32 %v487_v36, %v487_v36 }
 0x104   :  { %v187_v40 = vpop.f32.mrf.mxu0  ;;  %v499_v41 = vpop.f32.mrf.mxu1 }
 0x105   :  { %309 = vst [vmem:[#allocation8 + $0x10] sm:$0xff] %v187_v40  ;;  %v324_v43 = vadd.f32 %v323_v39, %v187_v40  ;;  %v346_v44 = vmul.f32 %v187_v40, %v187_v40  ;;  %318 = vst [vmem:[#allocation8 + $0x58] sm:$0xff] %v499_v41 }
 0x106   :  { %v490_v45 = vpop.f32.mrf.mxu0  ;;  %v227_v46 = vpop.f32.mrf.mxu1 }
 0x107   :  { %v361_v48 = vadd.f32 %v360_v42, %v346_v44  ;;  %312 = vst [vmem:[#allocation8 + $0x28] sm:$0xff] %v490_v45  ;;  %v325_v49 = vadd.f32 %v487_v36, %v324_v43  ;;  %317 = vst [vmem:[#allocation8 + $0x50] sm:$0xff] %v227_v46  ;;  %v349_v57 = vmul.f32 %v490_v45, %v490_v45 }
 0x108   :  { %v197_v50 = vpop.f32.mrf.mxu0  ;;  %v502_v51 = vpop.f32.mrf.mxu1 }
 0x109   :  { %311 = vst [vmem:[#allocation8 + $0x20] sm:$0xff] %v197_v50  ;;  %v326_v52 = vadd.f32 %v325_v49, %v197_v50  ;;  %v348_v53 = vmul.f32 %v197_v50, %v197_v50  ;;  %v362_v54 = vadd.f32 %v361_v48, %v347_v47  ;;  %320 = vst [vmem:[#allocation8 + $0x68] sm:$0xff] %v502_v51 }
 0x10a   :  { %v493_v55 = vpop.f32.mrf.mxu0  ;;  %v237_v56 = vpop.f32.mrf.mxu1 }
 0x10b   :  { %v363_v58 = vadd.f32 %v362_v54, %v348_v53  ;;  %314 = vst [vmem:[#allocation8 + $0x38] sm:$0xff] %v493_v55  ;;  %v327_v59 = vadd.f32 %v490_v45, %v326_v52  ;;  %319 = vst [vmem:[#allocation8 + $0x60] sm:$0xff] %v237_v56  ;;  %v351_v2 = vmul.f32 %v493_v55, %v493_v55 }
 0x10c   :  { %v207_v60 = vpop.f32.mrf.mxu0  ;;  %v505_v61 = vpop.f32.mrf.mxu1 }
 0x10d   :  { %313 = vst [vmem:[#allocation8 + $0x30] sm:$0xff] %v207_v60  ;;  %v328_v62 = vadd.f32 %v327_v59, %v207_v60  ;;  %v350_v63 = vmul.f32 %v207_v60, %v207_v60  ;;  %v364_v0 = vadd.f32 %v363_v58, %v349_v57  ;;  %322 = vst [vmem:[#allocation8 + $0x78] sm:$0xff] %v505_v61 }
 0x10e   :  { %v247_v1 = vpop.f32.mrf.mxu1 }
 0x10f   :  { %v329_v3 = vadd.f32 %v493_v55, %v328_v62  ;;  %v365_v4 = vadd.f32 %v364_v0, %v350_v63  ;;  %321 = vst [vmem:[#allocation8 + $0x70] sm:$0xff] %v247_v1 }
 0x110   :  { %595 = shalt.err (!%p592_p0)
}
 0x111   :  { %397 = dma.vmem_to_hbm [thread:$0]  %s392_s1, 2048, %s687_s2, [#allocation5], %s633_s15, %s633_s15, %s634_s16   ;;  %v366_v5 = vadd.f32 %v365_v4, %v351_v2  ;;  %v330_v6 = vadd.f32 %v329_v3, %v217_v37  ;;  %v352_v7 = vmul.f32 %v217_v37, %v217_v37  ;;  %v353_v8 = vmul.f32 %v670_v34, %v670_v34 }
 0x112   :  { %v354_v12 = vmul.f32 %v227_v46, %v227_v46  ;;  %v355_v14 = vmul.f32 %v499_v41, %v499_v41  ;;  %v356_v18 = vmul.f32 %v237_v56, %v237_v56  ;;  %v357_v20 = vmul.f32 %v502_v51, %v502_v51  ;;  %s637_s2 = smov [#allocation9]  }
 0x113   :  { %v367_v9 = vadd.f32 %v366_v5, %v352_v7  ;;  %v331_v10 = vadd.f32 %v670_v34, %v330_v6  ;;  %v358_v24 = vmul.f32 %v247_v1, %v247_v1  ;;  %v359_v26 = vmul.f32 %v505_v61, %v505_v61  ;;  %s404_s27 = sshll.u32 %s637_s2, 4  ;;  %s405_s27 = int_to_ptr.vmem [resolvable:$true] %s404_s27 }
 0x114   :  { %vm381_vm0 = vcmask 1040384   ;;  %vm383_vm1 = vcmask 1041408   ;;  %s604_s28 = scalar_lea.vmem %s405_s27, 128  ;;  %p609_p2 = scmp.lt.s32.totalorder %s405_s27, %s405_s27 }
 0x115   :  { %v332_v11 = vadd.f32 %v331_v10, %v227_v46  ;;  %v368_v13 = vadd.f32 %v367_v9, %v353_v8  ;;  %p605_p1 = scmp.ne.s32.totalorder %s405_s27, %s604_s28  ;;  %p610_p3 = scmp.lt.s32.totalorder %s604_s28, %s604_s28 }
 0x117   :  { %v369_v15 = vadd.f32 %v368_v13, %v354_v12  ;;  %v333_v16 = vadd.f32 %v499_v41, %v332_v11  ;;  %p611_p4 = por %p610_p3, %p609_p2 }
 0x119   :  { %v334_v17 = vadd.f32 %v333_v16, %v237_v56  ;;  %v370_v19 = vadd.f32 %v369_v15, %v355_v14  ;;  %p612_p5 = pnand %p611_p4, %p605_p1 }
 0x11b   :  { %v371_v21 = vadd.f32 %v370_v19, %v356_v18  ;;  %v335_v22 = vadd.f32 %v502_v51, %v334_v17 }
 0x11d   :  { %v336_v23 = vadd.f32 %v335_v22, %v247_v1  ;;  %v372_v25 = vadd.f32 %v371_v21, %v357_v20 }
 0x11f   :  { %v337_v27 = vadd.f32 %v505_v61, %v336_v23  ;;  %v373_v28 = vadd.f32 %v372_v25, %v358_v24 }
 0x121   :  { %v338_v29 = vrot.slane %v337_v27, 4  ;;  %v374_v30 = vadd.f32 %v373_v28, %v359_v26 }
 0x123   :  { %v339_v31 = vadd.f32 %v338_v29, %v337_v27  ;;  %v375_v32 = vrot.slane %v374_v30, 4 }
 0x125   :  { %v340_v33 = vrot.slane %v339_v31, 2  ;;  %v376_v34 = vadd.f32 %v375_v32, %v374_v30 }
 0x127   :  { %v341_v35 = vadd.f32 %v340_v33, %v339_v31  ;;  %v377_v36 = vrot.slane %v376_v34, 2 }
 0x129   :  { %v342_v37 = vrot.slane %v341_v35, 1  ;;  %v378_v38 = vadd.f32 %v377_v36, %v376_v34 }
 0x12b   :  { %v379_v39 = vrot.slane %v378_v38, 1  ;;  %v343_v40 = vadd.f32 %v342_v37, %v341_v35 }
 0x12d   :  { %v380_v41 = vadd.f32 %v379_v39, %v378_v38 }
 0x12f   :  { %v382_v42 = vsel %vm381_vm0, %v343_v40, %v380_v41 }
 0x130   :  { %v384_v43 = vsel %vm383_vm1, %v382_v42, 0.0 }
 0x131   :  { %385 = vst [vmem:[#allocation9] sm:$0xff] %v384_v43 }
 0x132   :  { %615 = shalt.err (!%p612_p5)
}
 0x133   :  { %407 = dma.vmem_to_hbm [thread:$0]  %s405_s27, 128, %s688_s3, [#allocation10]  }
 0x134   :  { %628 = dma.done.wait [#allocation5], 2048  }
 0x135   :  { %629 = vsyncadd [#allocation5], 4294965248 }
 0x136   :  { %630 = dma.done.wait [#allocation10], 128  }
 0x137   :  { %631 = vsyncadd [#allocation10], 4294967168 }
 0x138   :  { %414 = vsyncpa [#allocation4], 1 }
 0x139   :  { %415 = vsyncpa [#allocation7], 1 }
 0x13a   :  { %416 = vsyncpa [#allocation5], 1 }
 0x13b   :  { %417 = vsyncpa [#allocation10], 1 }

</bundles_post_ra>
